<compile_context>
chip_gen: v7x
topology: tpu7x:2x2x1
jax: 0.10.0
libtpu: 0.0.40
codegen_flags: <defaults>
</compile_context>

<pallas_src>
import jax
import jax.numpy as jnp
from jax.experimental import pallas as pl
from jax.experimental.pallas import tpu as pltpu

BN_EPS = 1e-5
BN_SCALE = 1.0 / (1.0 + BN_EPS) ** 0.5   # eval-mode BatchNorm1d with default stats
LANE = 128
MAX_TB = 256                             # batch-tile rows (multiple of 8)


def _round_up(n, m):
    return ((n + m - 1) // m) * m


def _make_mlp_kernel(n_layers, slope, out_dim):
    """Kernel body refs: x_ref, w0, b0, w1, b1, ..., o_ref."""
    def kernel(*refs):
        x_ref = refs[0]
        o_ref = refs[-1]
        wb = refs[1:-1]
        h = x_ref[...]                                     # bf16 (TB, K_pad)
        for i in range(n_layers):
            w = wb[2 * i][...]                             # bf16 (P_in, P_out)
            b = wb[2 * i + 1][...]                         # f32  (1, P_out)
            h = jnp.dot(h, w, preferred_element_type=jnp.float32) + b
            if i < n_layers - 1:
                # BatchNorm1d (eval) already folded into w/b; Dropout = identity.
                if slope == 0.0:
                    h = jnp.maximum(h, 0.0)                # ReLU
                else:
                    h = jnp.where(h > 0.0, h, slope * h)   # LeakyReLU / PReLU
                h = h.astype(jnp.bfloat16)                 # bf16 operand for next MXU pass
        # Masked single-tile store of the valid lanes only (no wrapper-side slice).
        o_ref[...] = h[:, :out_dim]
    return kernel


def mlp_forward(x, padded_weights, padded_biases, slope, out_dim):
    """x: (B, C_in) f32. padded_weights[i]: bf16 (P_i, P_{i+1}); padded_biases[i]: f32 (1, P_{i+1}).
    Returns (B, out_dim) f32."""
    B, c_in = x.shape
    n_layers = len(padded_weights)
    k_pad = padded_weights[0].shape[0]

    # Batch tiling: TB divides the (sublane-rounded) batch.
    b_pad = _round_up(B, 8)
    tb = min(b_pad, MAX_TB)
    while b_pad % tb:
        tb //= 2
    grid = (b_pad // tb,)

    # Zero-pad rows (to B_pad) and feature columns (to K_pad); cast to bf16.
    x_p = jnp.zeros((b_pad, k_pad), jnp.bfloat16).at[:B, :c_in].set(x.astype(jnp.bfloat16))

    flat_params = []
    for w, b in zip(padded_weights, padded_biases):
        flat_params.extend([w, b])

    # --- VMEM budget + cost estimate -------------------------------------------------
    param_bytes = sum(int(a.size) * a.dtype.itemsize for a in flat_params)
    max_width = max(max(int(w.shape[1]) for w in padded_weights), k_pad)
    act_bytes = tb * max_width * 4                      # f32 intermediate
    needed = (param_bytes
              + 2 * tb * k_pad * 2                      # double-buffered x tile (bf16)
              + 2 * tb * out_dim * 4                    # double-buffered out tile (f32)
              + 4 * act_bytes)                          # headroom for intermediates
    vmem_limit = int(min(48 << 20, max(2 * needed, 32 << 20)))

    flops = 2 * b_pad * sum(int(w.shape[0]) * int(w.shape[1]) for w in padded_weights)
    bytes_accessed = int(x_p.size) * 2 + param_bytes + b_pad * out_dim * 4
    cost = pl.CostEstimate(flops=flops, transcendentals=0, bytes_accessed=bytes_accessed)

    # --- specs -----------------------------------------------------------------------
    in_specs = [pl.BlockSpec((tb, k_pad), lambda i: (i, 0))]           # tiled x
    in_specs += [pl.BlockSpec(memory_space=pltpu.MemorySpace.VMEM)] * len(flat_params)
    out_specs = pl.BlockSpec((tb, out_dim), lambda i: (i, 0))          # tiled output

    out = pl.pallas_call(
        _make_mlp_kernel(n_layers, slope, out_dim),
        out_shape=jax.ShapeDtypeStruct((b_pad, out_dim), jnp.float32),
        grid=grid,
        in_specs=in_specs,
        out_specs=out_specs,
        compiler_params=pltpu.CompilerParams(
            dimension_semantics=("parallel",),
            vmem_limit_bytes=vmem_limit,
        ),
        cost_estimate=cost,
    )(x_p, *flat_params)

    if b_pad != B:                      # only when batch needed sublane rounding
        out = out[:B]
    return out


def init_mlp_params(key, num_channels):
    """PyTorch nn.Linear default init (uniform +/- 1/sqrt(fan_in)); W stored (in, out)."""
    weights, biases = [], []
    for i in range(len(num_channels) - 1):
        fan_in, fan_out = num_channels[i], num_channels[i + 1]
        key, kw, kb = jax.random.split(key, 3)
        bound = 1.0 / (fan_in ** 0.5)
        weights.append(jax.random.uniform(kw, (fan_in, fan_out), jnp.float32, -bound, bound))
        biases.append(jax.random.uniform(kb, (fan_out,), jnp.float32, -bound, bound))
    return weights, biases


def prepare_params(weights, biases, lane=LANE):
    """One-time prep: fold eval-mode BN scale into every non-final Linear, zero-pad
    every K / N dim to lane multiples, cast weights to bf16 (biases stay f32)."""
    n_layers = len(weights)
    padded_w, padded_b = [], []
    prev_pad = _round_up(weights[0].shape[0], lane)     # input K padded too
    for i, (w, b) in enumerate(zip(weights, biases)):
        c_in, c_out = w.shape
        if i < n_layers - 1:                            # BN follows this Linear -> fold
            w = w * BN_SCALE
            b = b * BN_SCALE
        c_out_p = _round_up(c_out, lane)
        wp = (jnp.zeros((prev_pad, c_out_p), jnp.float32)
              .at[:c_in, :c_out].set(w)
              .astype(jnp.bfloat16))
        bp = jnp.zeros((1, c_out_p), jnp.float32).at[0, :c_out].set(b)
        padded_w.append(wp)
        padded_b.append(bp)
        prev_pad = c_out_p
    return padded_w, padded_b


def reference(x, weights, biases, slope):
    """Pure-JAX f32 reference of the eval-mode PyTorch MLP forward."""
    h = x
    n_layers = len(weights)
    for i in range(n_layers):
        h = h @ weights[i] + biases[i]
        if i < n_layers - 1:
            h = h * BN_SCALE                             # BatchNorm1d (eval)
            h = jnp.where(h > 0.0, h, slope * h)         # activation
            # Dropout: identity in eval mode
    return h


if __name__ == "__main__":
    # MLP(num_channels=[32, 64, 10], drop_rate=0.5, act_type='relu')
    num_channels = [32, 64, 10]
    act_type = "relu"
    drop_rate = 0.5          # identity in eval mode
    slope = {"relu": 0.0, "leakyrelu": 0.01, "prelu": 0.25}[act_type]
    B = 512                  # enough rows for a 2-step batch grid (TB = 256)

    key = jax.random.PRNGKey(0)
    kx, kp = jax.random.split(key)
    x = jax.random.normal(kx, (B, num_channels[0]), jnp.float32)
    weights, biases = init_mlp_params(kp, num_channels)
    padded_w, padded_b = prepare_params(weights, biases)

    fwd = jax.jit(lambda xx: mlp_forward(xx, padded_w, padded_b, slope, num_channels[-1]))
    out = jax.block_until_ready(fwd(x))

    ref = reference(x, weights, biases, slope)
    assert out.shape == (B, num_channels[-1]), out.shape
    # bf16 weights / inputs with f32 accumulation: loosened tolerance vs f32 reference.
    assert jnp.allclose(out, ref, atol=5e-2, rtol=5e-2), float(jnp.abs(out - ref).max())

    print("KERNEL_OK")
</pallas_src>

<mosaic_0001>
module attributes {stable_mosaic.version = 11 : i64} {
  func.func @kernel(%arg0: i32, %arg1: memref<256x128xbf16, #tpu.memory_space<vmem>>, %arg2: memref<128x128xbf16, #tpu.memory_space<vmem>>, %arg3: memref<1x128xf32, #tpu.memory_space<vmem>>, %arg4: memref<128x128xbf16, #tpu.memory_space<vmem>>, %arg5: memref<1x128xf32, #tpu.memory_space<vmem>>, %arg6: memref<256x10xf32, #tpu.memory_space<vmem>>) attributes {dimension_semantics = [#tpu.dimension_semantics<parallel>], iteration_bounds = array<i64: 2>, scalar_prefetch = 0 : i64, scratch_operands = 0 : i64, tpu.core_type = #tpu.core_type<tc>, window_params = [{transform_indices = @transform_0, window_bounds = array<i64: 256, 128>}, {pipeline_mode = #tpu.pipeline_mode<synchronous>, transform_indices = @transform_1, window_bounds = array<i64: 128, 128>}, {pipeline_mode = #tpu.pipeline_mode<synchronous>, transform_indices = @transform_2, window_bounds = array<i64: 1, 128>}, {pipeline_mode = #tpu.pipeline_mode<synchronous>, transform_indices = @transform_3, window_bounds = array<i64: 128, 128>}, {pipeline_mode = #tpu.pipeline_mode<synchronous>, transform_indices = @transform_4, window_bounds = array<i64: 1, 128>}, {transform_indices = @transform_5, window_bounds = array<i64: 256, 10>}]} {
    %c0 = arith.constant 0 : index
    %c0_0 = arith.constant 0 : index
    %0 = vector.load %arg1[%c0, %c0_0] : memref<256x128xbf16, #tpu.memory_space<vmem>>, vector<256x128xbf16>
    %c0_1 = arith.constant 0 : index
    %c0_2 = arith.constant 0 : index
    %1 = vector.load %arg2[%c0_1, %c0_2] : memref<128x128xbf16, #tpu.memory_space<vmem>>, vector<128x128xbf16>
    %c0_3 = arith.constant 0 : index
    %c0_4 = arith.constant 0 : index
    %2 = vector.load %arg3[%c0_3, %c0_4] : memref<1x128xf32, #tpu.memory_space<vmem>>, vector<1x128xf32>
    %cst = arith.constant dense<0.000000e+00> : vector<256x128xf32>
    %3 = tpu.matmul %0, %1, %cst {dimension_numbers = #tpu.dot_dimension_numbers<[1], [0], [0], [1], [0, 0, 1, 1], [], []>} : vector<256x128xbf16>, vector<128x128xbf16>, vector<256x128xf32> -> vector<256x128xf32>
    %4 = vector.broadcast %2 : vector<1x128xf32> to vector<256x128xf32>
    %5 = arith.addf %3, %4 : vector<256x128xf32>
    %cst_5 = arith.constant 0.000000e+00 : f32
    %6 = vector.broadcast %cst_5 : f32 to vector<256x128xf32>
    %7 = arith.maximumf %5, %6 : vector<256x128xf32>
    %8 = arith.truncf %7 : vector<256x128xf32> to vector<256x128xbf16>
    %c0_6 = arith.constant 0 : index
    %c0_7 = arith.constant 0 : index
    %9 = vector.load %arg4[%c0_6, %c0_7] : memref<128x128xbf16, #tpu.memory_space<vmem>>, vector<128x128xbf16>
    %c0_8 = arith.constant 0 : index
    %c0_9 = arith.constant 0 : index
    %10 = vector.load %arg5[%c0_8, %c0_9] : memref<1x128xf32, #tpu.memory_space<vmem>>, vector<1x128xf32>
    %cst_10 = arith.constant dense<0.000000e+00> : vector<256x128xf32>
    %11 = tpu.matmul %8, %9, %cst_10 {dimension_numbers = #tpu.dot_dimension_numbers<[1], [0], [0], [1], [0, 0, 1, 1], [], []>} : vector<256x128xbf16>, vector<128x128xbf16>, vector<256x128xf32> -> vector<256x128xf32>
    %12 = vector.broadcast %10 : vector<1x128xf32> to vector<256x128xf32>
    %13 = arith.addf %11, %12 : vector<256x128xf32>
    %14 = vector.extract_strided_slice %13 {offsets = [0, 0], sizes = [256, 10], strides = [1, 1]} : vector<256x128xf32> to vector<256x10xf32>
    %c0_11 = arith.constant 0 : index
    %c0_12 = arith.constant 0 : index
    %15 = vector.load %arg6[%c0_11, %c0_12] : memref<256x10xf32, #tpu.memory_space<vmem>>, vector<256x10xf32>
    tpu.vector_store %arg6[%c0_11, %c0_12], %14 {strides = array<i32>} : memref<256x10xf32, #tpu.memory_space<vmem>>, vector<256x10xf32>,
    return
  }
  func.func @transform_0(%arg0: i32) -> (i32, i32) {
    %c0_i32 = arith.constant 0 : i32
    %c0_i32_0 = arith.constant 0 : i32
    return %arg0, %c0_i32 : i32, i32
  }
  func.func @transform_1(%arg0: i32) -> (i32, i32) {
    %c0_i32 = arith.constant 0 : i32
    %c0_i32_0 = arith.constant 0 : i32
    %c0_i32_1 = arith.constant 0 : i32
    return %c0_i32, %c0_i32_0 : i32, i32
  }
  func.func @transform_2(%arg0: i32) -> (i32, i32) {
    %c0_i32 = arith.constant 0 : i32
    %c0_i32_0 = arith.constant 0 : i32
    %c0_i32_1 = arith.constant 0 : i32
    return %c0_i32, %c0_i32_0 : i32, i32
  }
  func.func @transform_3(%arg0: i32) -> (i32, i32) {
    %c0_i32 = arith.constant 0 : i32
    %c0_i32_0 = arith.constant 0 : i32
    %c0_i32_1 = arith.constant 0 : i32
    return %c0_i32, %c0_i32_0 : i32, i32
  }
  func.func @transform_4(%arg0: i32) -> (i32, i32) {
    %c0_i32 = arith.constant 0 : i32
    %c0_i32_0 = arith.constant 0 : i32
    %c0_i32_1 = arith.constant 0 : i32
    return %c0_i32, %c0_i32_0 : i32, i32
  }
  func.func @transform_5(%arg0: i32) -> (i32, i32) {
    %c0_i32 = arith.constant 0 : i32
    %c0_i32_0 = arith.constant 0 : i32
    return %arg0, %c0_i32 : i32, i32
  }
}

</mosaic_0001>

<bundles_post_ra>
// kernel: _lambda_.1
= control target key start
LH: loop header
LB: loop body
LE: loop exit
PB: predicated region body
PF: predicated region fallthrough
CT: control target
= control target key end

     0   :  { %s1225_s18 = smov 0   ;;  %s1452_s0 = inlined_call_operand.vmem [shape: bf16[512,128], index: 0, kind: input, shape index: {}]   ;;  %s1453_s1 = inlined_call_operand.vmem [shape: bf16[128,128], index: 1, kind: input, shape index: {}]   ;;  %s1454_s2 = inlined_call_operand.vmem [shape: f32[1,128], index: 2, kind: input, shape index: {}]   ;;  %s1455_s3 = inlined_call_operand.vmem [shape: bf16[128,128], index: 3, kind: input, shape index: {}]   ;;  %s1456_s4 = inlined_call_operand.vmem [shape: f32[1,128], index: 4, kind: input, shape index: {}]   ;;  %s1457_s5 = inlined_call_operand.vmem [shape: f32[512,10], index: 5, kind: output, shape index: {}]  }
   0x1 LB: > { %s958_s19 = sadd.s32 4294967295, %s1193_s18   ;;  %p962_p0 = scmp.ge.s32.totalorder %s1193_s18, 1  ;;  %s1193_s18 = sphi %s1225_s18, %s15_s18  }
   0x2   : > { %p188_p1 = scmp.lt.s32.totalorder %s1193_s18, 3 }
   0x4   : > { %p189_p2 = pnand %p962_p0, %p188_p1 }
   0x5   : > { %v1155_v0 = vld [vmem:[%s1453_s1] sm:$0xff] (!%p189_p2)   ;;  %s963_s22 = sshll.u32 (!%p189_p2), %s958_s19, 5  ;;  %v1156_v1 = vld [vmem:[%s1453_s1 + $0x8] sm:$0xff] (!%p189_p2)   ;;  %v1157_v2 = vld [vmem:[%s1453_s1 + $0x10] sm:$0xff] (!%p189_p2)   ;;  %vm869_vm0 = vcmask (!%p189_p2), 80896  }
   0x6   : > { %192 = sbr.rel (%p189_p2) target bundleno = 534 (0x216), region = 40  ;;  %p217_p3 = scmp.lt.s32.totalorder (!%p189_p2), %s963_s22, 63  ;;  %1051 = vmatprep.subr.bf16.mxu0 (!%p189_p2), %v1155_v0  ;;  %v1158_v3 = vld [vmem:[%s1453_s1 + $0x18] sm:$0xff] (!%p189_p2)   ;;  %v1159_v5 = vld [vmem:[%s1453_s1 + $0x20] sm:$0xff] (!%p189_p2)   ;;  %v1160_v6 = vld [vmem:[%s1453_s1 + $0x28] sm:$0xff] (!%p189_p2)  }
   0x7   : > { %1052 = vmatpush3.bf16.msra.mxu0 (!%p189_p2), %v1155_v0  ;;  %v1161_v7 = vld [vmem:[%s1453_s1 + $0x30] sm:$0xff] (!%p189_p2)   ;;  %v1162_v8 = vld [vmem:[%s1453_s1 + $0x38] sm:$0xff] (!%p189_p2)   ;;  %v1179_v9 = vld [vmem:[%s1455_s3] sm:$0xff] (!%p189_p2)  }
   0x8   : > { %1053 = vmatprep.subr.bf16.mxu0 (!%p189_p2), %v1156_v1  ;;  %v1180_v10 = vld [vmem:[%s1455_s3 + $0x8] sm:$0xff] (!%p189_p2)   ;;  %1099 = vmatprep.subr.bf16.mxu1 (!%p189_p2), %v1179_v9  ;;  %v1181_v11 = vld [vmem:[%s1455_s3 + $0x10] sm:$0xff] (!%p189_p2)   ;;  %v1182_v14 = vld [vmem:[%s1455_s3 + $0x18] sm:$0xff] (!%p189_p2)  }
   0x9   : > { %1100 = vmatpush3.bf16.msra.mxu1 (!%p189_p2), %v1179_v9  ;;  %v1183_v15 = vld [vmem:[%s1455_s3 + $0x20] sm:$0xff] (!%p189_p2)   ;;  %v1184_v18 = vld [vmem:[%s1455_s3 + $0x28] sm:$0xff] (!%p189_p2)   ;;  %v1185_v30 = vld [vmem:[%s1455_s3 + $0x30] sm:$0xff] (!%p189_p2)  }
   0xa   : > { %1101 = vmatprep.subr.bf16.mxu1 (!%p189_p2), %v1180_v10  ;;  %v1186_v31 = vld [vmem:[%s1455_s3 + $0x38] sm:$0xff] (!%p189_p2)   ;;  %v1308_v32 = vld [vmem:[%s1454_s2] ss:$0 sm:$0xff] (!%p189_p2) }
   0xb   : > { %1054 = vmatpush3.bf16.msra.mxu0 (!%p189_p2), %v1156_v1 }
   0xc   : > { %1055 = vmatprep.subr.bf16.mxu0 (!%p189_p2), %v1157_v2 }
   0xd   : > { %s1459_s22 = smov (!%p217_p3, %s963_s22), 63  ;;  %1102 = vmatpush3.bf16.msra.mxu1 %v1180_v10 }
   0xe   : > { %s964_s27 = sshll.u32 %s1459_s22, 2  ;;  %1103 = vmatprep.subr.bf16.mxu1 %v1181_v11 }
   0xf   : > { %s1248_s30 = scalar_lea.vmem %s1452_s0, %s964_s27  ;;  %1056 = vmatpush3.bf16.msra.mxu0 %v1157_v2 }
  0x10   : > { %v1163_v4 = vld [vmem:[%s1248_s30] sm:$0xff]   ;;  %1057 = vmatprep.subr.bf16.mxu0 %v1158_v3  ;;  %v1164_v12 = vld [vmem:[%s1248_s30 + $0x8] sm:$0xff]   ;;  %v1165_v13 = vld [vmem:[%s1248_s30 + $0x10] sm:$0xff]  }
  0x11   : > { %1067 = vmatprep.mubr.bf16.mxu0 %v1163_v4  ;;  %1104 = vmatpush3.bf16.msra.mxu1 %v1181_v11  ;;  %v1166_v16 = vld [vmem:[%s1248_s30 + $0x18] sm:$0xff]   ;;  %v1167_v17 = vld [vmem:[%s1248_s30 + $0x20] sm:$0xff]   ;;  %v1168_v19 = vld [vmem:[%s1248_s30 + $0x28] sm:$0xff]  }
  0x12   : > { %1105 = vmatprep.subr.bf16.mxu1 %v1182_v14  ;;  %v1169_v20 = vld [vmem:[%s1248_s30 + $0x30] sm:$0xff]   ;;  %v1170_v21 = vld [vmem:[%s1248_s30 + $0x38] sm:$0xff]   ;;  %v1171_v22 = vld [vmem:[%s1248_s30 + $0x40] sm:$0xff]  }
  0x13   : > { %1058 = vmatpush3.bf16.msra.mxu0 %v1158_v3  ;;  %v1172_v23 = vld [vmem:[%s1248_s30 + $0x48] sm:$0xff]   ;;  %v1173_v24 = vld [vmem:[%s1248_s30 + $0x50] sm:$0xff]   ;;  %v1174_v25 = vld [vmem:[%s1248_s30 + $0x58] sm:$0xff]  }
  0x14   : > { %1059 = vmatprep.subr.bf16.mxu0 %v1159_v5  ;;  %v1175_v26 = vld [vmem:[%s1248_s30 + $0x60] sm:$0xff]   ;;  %v1176_v27 = vld [vmem:[%s1248_s30 + $0x68] sm:$0xff]   ;;  %v1177_v28 = vld [vmem:[%s1248_s30 + $0x70] sm:$0xff]  }
  0x15   : > { %1106 = vmatpush3.bf16.msra.mxu1 %v1182_v14  ;;  %v1178_v29 = vld [vmem:[%s1248_s30 + $0x78] sm:$0xff]   ;;  %s966_s30 = sshll.u32 %s1459_s22, 3 }
  0x16   : > { %1107 = vmatprep.subr.bf16.mxu1 %v1183_v15  ;;  %s1351_s16 = scalar_lea.vmem %s1457_s5, %s966_s30 }
  0x17   : > { %1060 = vmatpush3.bf16.msra.mxu0 %v1159_v5 }
  0x18   : > { %1061 = vmatprep.subr.bf16.mxu0 %v1160_v6 }
  0x19   : > { %1108 = vmatpush3.bf16.msra.mxu1 %v1183_v15 }
  0x1a   : > { %1109 = vmatprep.subr.bf16.mxu1 %v1184_v18 }
  0x1b   : > { %1062 = vmatpush3.bf16.msra.mxu0 %v1160_v6 }
  0x1c   : > { %1063 = vmatprep.subr.bf16.mxu0 %v1161_v7 }
  0x1d   : > { %1110 = vmatpush3.bf16.msra.mxu1 %v1184_v18 }
  0x1e   : > { %1111 = vmatprep.subr.bf16.mxu1 %v1185_v30 }
  0x1f   : > { %1064 = vmatpush3.bf16.msra.mxu0 %v1161_v7 }
  0x20   : > { %1065 = vmatprep.subr.bf16.mxu0 %v1162_v8 }
  0x21   : > { %1112 = vmatpush3.bf16.msra.mxu1 %v1185_v30 }
  0x22   : > { %1113 = vmatprep.subr.bf16.mxu1 %v1186_v31 }
  0x23   : > { %1066 = vmatpush3.bf16.msra.mxu0 %v1162_v8 }
  0x25   : > { %1114 = vmatpush3.bf16.msra.mxu1 %v1186_v31 }
  0x26   : > { %1068 = vmatmul.mubr.bf16.vlgmr.msra.gmra.mrb[0].mxu0 %v1164_v12 }
  0x27   : > { %1071 = vmatprep.mubr.bf16.mxu0 %v1165_v13 }
  0x2e   : > { %1072 = vmatmul.mubr.bf16.gmra.mrb[4].mxu0 %v1166_v16 }
  0x2f   : > { %1075 = vmatprep.mubr.bf16.mxu0 %v1167_v17 }
  0x36   : > { %1076 = vmatmul.mubr.bf16.gmra.mrb[8].mxu0 %v1168_v19 }
  0x37   : > { %1079 = vmatprep.mubr.bf16.mxu0 %v1169_v20 }
  0x3e   : > { %1080 = vmatmul.mubr.bf16.gmra.mrb[12].mxu0 %v1170_v21 }
  0x3f   : > { %1083 = vmatprep.mubr.bf16.mxu0 %v1171_v22 }
  0x46   : > { %1084 = vmatmul.mubr.bf16.gmra.mrb[16].mxu0 %v1172_v23 }
  0x47   : > { %1087 = vmatprep.mubr.bf16.mxu0 %v1173_v24 }
  0x4e   : > { %1088 = vmatmul.mubr.bf16.gmra.mrb[20].mxu0 %v1174_v25 }
  0x4f   : > { %1091 = vmatprep.mubr.bf16.mxu0 %v1175_v26 }
  0x56   : > { %1092 = vmatmul.mubr.bf16.gmra.mrb[24].mxu0 %v1176_v27 }
  0x57   : > { %1095 = vmatprep.mubr.bf16.mxu0 %v1177_v28 }
  0x5e   : > { %1096 = vmatmul.mubr.bf16.gmra.mrb[28].mxu0 %v1178_v29 }
  0xf9   : > { %v1069_v33 = vpop.f32.mrb[0].mxu0 }
  0xfa   : > { %v471_v34 = vadd.f32 %v1069_v33, %v1308_v32  ;;  %v462_v35 = vpop.f32.mrb[1].mxu0 }
  0xfb   : > { %v463_v36 = vadd.f32 %v1308_v32, %v462_v35  ;;  %v1070_v37 = vpop.f32.mrb[2].mxu0 }
  0xfc   : > { %v474_v38 = vadd.f32 %v1070_v37, %v1308_v32  ;;  %v465_v39 = vpop.f32.mrb[3].mxu0  ;;  %v591_v41 = vmax.f32 %v471_v34, 0.0 }
  0xfd   : > { %v466_v40 = vadd.f32 %v1308_v32, %v465_v39  ;;  %v589_v43 = vmax.f32 %v463_v36, 0.0 }
  0xfe   : > { %v592_v42 = vmax.f32 %v474_v38, 0.0 }
  0xff   : > { %v590_v44 = vmax.f32 %v466_v40, 0.0 }
 0x100   : > { %v622_v45 = vpack.c.bf16 %v592_v42, %v591_v41 }
 0x101   : > { %v1073_v46 = vpop.f32.mrb[4].mxu0  ;;  %v621_v47 = vpack.c.bf16 %v590_v44, %v589_v43 }
 0x102   : > { %v487_v48 = vadd.f32 %v1073_v46, %v1308_v32  ;;  %v478_v49 = vpop.f32.mrb[5].mxu0 }
 0x103   : > { %v479_v50 = vadd.f32 %v1308_v32, %v478_v49  ;;  %v1074_v51 = vpop.f32.mrb[6].mxu0  ;;  %1115 = vmatprep.mubr.bf16.mxu1 %v621_v47 }
 0x104   : > { %v490_v52 = vadd.f32 %v1074_v51, %v1308_v32  ;;  %v481_v53 = vpop.f32.mrb[7].mxu0  ;;  %1116 = vmatmul.mubr.bf16.vlgmr.msra.gmra.mrb[0].mxu1 %v622_v45  ;;  %v595_v55 = vmax.f32 %v487_v48, 0.0 }
 0x105   : > { %v482_v54 = vadd.f32 %v1308_v32, %v481_v53  ;;  %v593_v57 = vmax.f32 %v479_v50, 0.0 }
 0x106   : > { %v596_v56 = vmax.f32 %v490_v52, 0.0 }
 0x107   : > { %v594_v58 = vmax.f32 %v482_v54, 0.0 }
 0x108   : > { %v624_v59 = vpack.c.bf16 %v596_v56, %v595_v55 }
 0x109   : > { %v623_v60 = vpack.c.bf16 %v594_v58, %v593_v57  ;;  %v1077_v61 = vpop.f32.mrb[8].mxu0 }
 0x10a   : > { %v503_v62 = vadd.f32 %v1077_v61, %v1308_v32  ;;  %v494_v63 = vpop.f32.mrb[9].mxu0 }
 0x10b   : > { %v495_v0 = vadd.f32 %v1308_v32, %v494_v63  ;;  %v1078_v1 = vpop.f32.mrb[10].mxu0  ;;  %1119 = vmatprep.mubr.bf16.mxu1 %v623_v60 }
 0x10c   : > { %v506_v2 = vadd.f32 %v1078_v1, %v1308_v32  ;;  %v497_v3 = vpop.f32.mrb[11].mxu0  ;;  %1120 = vmatmul.mubr.bf16.gmra.mrb[4].mxu1 %v624_v59  ;;  %v599_v5 = vmax.f32 %v503_v62, 0.0 }
 0x10d   : > { %v498_v4 = vadd.f32 %v1308_v32, %v497_v3  ;;  %v597_v7 = vmax.f32 %v495_v0, 0.0 }
 0x10e   : > { %v600_v6 = vmax.f32 %v506_v2, 0.0 }
 0x10f   : > { %v598_v8 = vmax.f32 %v498_v4, 0.0 }
 0x110   : > { %v626_v9 = vpack.c.bf16 %v600_v6, %v599_v5 }
 0x111   : > { %v625_v10 = vpack.c.bf16 %v598_v8, %v597_v7  ;;  %v1081_v11 = vpop.f32.mrb[12].mxu0 }
 0x112   : > { %v519_v12 = vadd.f32 %v1081_v11, %v1308_v32  ;;  %v510_v13 = vpop.f32.mrb[13].mxu0 }
 0x113   : > { %v511_v14 = vadd.f32 %v1308_v32, %v510_v13  ;;  %v1082_v15 = vpop.f32.mrb[14].mxu0  ;;  %1123 = vmatprep.mubr.bf16.mxu1 %v625_v10 }
 0x114   : > { %v522_v16 = vadd.f32 %v1082_v15, %v1308_v32  ;;  %v513_v17 = vpop.f32.mrb[15].mxu0  ;;  %1124 = vmatmul.mubr.bf16.gmra.mrb[8].mxu1 %v626_v9  ;;  %v603_v19 = vmax.f32 %v519_v12, 0.0 }
 0x115   : > { %v514_v18 = vadd.f32 %v1308_v32, %v513_v17  ;;  %v601_v21 = vmax.f32 %v511_v14, 0.0 }
 0x116   : > { %v604_v20 = vmax.f32 %v522_v16, 0.0 }
 0x117   : > { %v602_v22 = vmax.f32 %v514_v18, 0.0  ;;  %v1346_v18 = vld [vmem:[%s1456_s4] ss:$0 sm:$0xff] }
 0x118   : > { %v628_v23 = vpack.c.bf16 %v604_v20, %v603_v19 }
 0x119   : > { %v627_v24 = vpack.c.bf16 %v602_v22, %v601_v21  ;;  %v1085_v25 = vpop.f32.mrb[16].mxu0 }
 0x11a   : > { %v535_v26 = vadd.f32 %v1085_v25, %v1308_v32  ;;  %v526_v27 = vpop.f32.mrb[17].mxu0 }
 0x11b   : > { %v527_v28 = vadd.f32 %v1308_v32, %v526_v27  ;;  %v1086_v29 = vpop.f32.mrb[18].mxu0  ;;  %1127 = vmatprep.mubr.bf16.mxu1 %v627_v24 }
 0x11c   : > { %v538_v30 = vadd.f32 %v1086_v29, %v1308_v32  ;;  %v529_v31 = vpop.f32.mrb[19].mxu0  ;;  %1128 = vmatmul.mubr.bf16.gmra.mrb[12].mxu1 %v628_v23  ;;  %v607_v34 = vmax.f32 %v535_v26, 0.0 }
 0x11d   : > { %v530_v33 = vadd.f32 %v1308_v32, %v529_v31  ;;  %v605_v36 = vmax.f32 %v527_v28, 0.0 }
 0x11e   : > { %v608_v35 = vmax.f32 %v538_v30, 0.0 }
 0x11f   : > { %v606_v37 = vmax.f32 %v530_v33, 0.0 }
 0x120   : > { %v630_v38 = vpack.c.bf16 %v608_v35, %v607_v34 }
 0x121   : > { %v629_v39 = vpack.c.bf16 %v606_v37, %v605_v36  ;;  %v1089_v40 = vpop.f32.mrb[20].mxu0 }
 0x122   : > { %v551_v41 = vadd.f32 %v1089_v40, %v1308_v32  ;;  %v542_v42 = vpop.f32.mrb[21].mxu0 }
 0x123   : > { %v543_v43 = vadd.f32 %v1308_v32, %v542_v42  ;;  %v1090_v44 = vpop.f32.mrb[22].mxu0  ;;  %1131 = vmatprep.mubr.bf16.mxu1 %v629_v39 }
 0x124   : > { %v554_v45 = vadd.f32 %v1090_v44, %v1308_v32  ;;  %v545_v46 = vpop.f32.mrb[23].mxu0  ;;  %1132 = vmatmul.mubr.bf16.gmra.mrb[16].mxu1 %v630_v38  ;;  %v611_v48 = vmax.f32 %v551_v41, 0.0 }
 0x125   : > { %v546_v47 = vadd.f32 %v1308_v32, %v545_v46  ;;  %v609_v50 = vmax.f32 %v543_v43, 0.0 }
 0x126   : > { %v612_v49 = vmax.f32 %v554_v45, 0.0 }
 0x127   : > { %v610_v51 = vmax.f32 %v546_v47, 0.0 }
 0x128   : > { %v632_v52 = vpack.c.bf16 %v612_v49, %v611_v48 }
 0x129   : > { %v631_v53 = vpack.c.bf16 %v610_v51, %v609_v50  ;;  %v1093_v54 = vpop.f32.mrb[24].mxu0 }
 0x12a   : > { %v567_v55 = vadd.f32 %v1093_v54, %v1308_v32  ;;  %v558_v56 = vpop.f32.mrb[25].mxu0 }
 0x12b   : > { %v559_v57 = vadd.f32 %v1308_v32, %v558_v56  ;;  %v1094_v58 = vpop.f32.mrb[26].mxu0  ;;  %1135 = vmatprep.mubr.bf16.mxu1 %v631_v53 }
 0x12c   : > { %v570_v59 = vadd.f32 %v1094_v58, %v1308_v32  ;;  %v561_v60 = vpop.f32.mrb[27].mxu0  ;;  %1136 = vmatmul.mubr.bf16.gmra.mrb[20].mxu1 %v632_v52  ;;  %v615_v62 = vmax.f32 %v567_v55, 0.0 }
 0x12d   : > { %v562_v61 = vadd.f32 %v1308_v32, %v561_v60  ;;  %v613_v0 = vmax.f32 %v559_v57, 0.0 }
 0x12e   : > { %v616_v63 = vmax.f32 %v570_v59, 0.0 }
 0x12f   : > { %v614_v1 = vmax.f32 %v562_v61, 0.0 }
 0x130   : > { %v634_v2 = vpack.c.bf16 %v616_v63, %v615_v62 }
 0x131   : > { %v633_v3 = vpack.c.bf16 %v614_v1, %v613_v0  ;;  %v1097_v4 = vpop.f32.mrb[28].mxu0 }
 0x132   : > { %v583_v5 = vadd.f32 %v1097_v4, %v1308_v32  ;;  %v574_v6 = vpop.f32.mrb[29].mxu0 }
 0x133   : > { %v575_v7 = vadd.f32 %v1308_v32, %v574_v6  ;;  %v1098_v8 = vpop.f32.mrb[30].mxu0  ;;  %1139 = vmatprep.mubr.bf16.mxu1 %v633_v3 }
 0x134   : > { %v586_v9 = vadd.f32 %v1098_v8, %v1308_v32  ;;  %v577_v10 = vpop.f32.mrb[31].mxu0  ;;  %1140 = vmatmul.mubr.bf16.gmra.mrb[24].mxu1 %v634_v2  ;;  %v619_v12 = vmax.f32 %v583_v5, 0.0 }
 0x135   : > { %v578_v11 = vadd.f32 %v1308_v32, %v577_v10  ;;  %v617_v14 = vmax.f32 %v575_v7, 0.0 }
 0x136   : > { %v620_v13 = vmax.f32 %v586_v9, 0.0 }
 0x137   : > { %v618_v15 = vmax.f32 %v578_v11, 0.0 }
 0x138   : > { %v636_v16 = vpack.c.bf16 %v620_v13, %v619_v12 }
 0x139   : > { %v635_v17 = vpack.c.bf16 %v618_v15, %v617_v14 }
 0x13b   : > { %1143 = vmatprep.mubr.bf16.mxu1 %v635_v17 }
 0x13c   : > { %1144 = vmatmul.mubr.bf16.gmra.mrb[28].mxu1 %v636_v16 }
 0x1d7   : > { %v1117_v32 = vpop.f32.mrb[0].mxu1 }
 0x1d8   : > { %v751_v19 = vadd.f32 %v1117_v32, %v1346_v18  ;;  %v742_v20 = vpop.f32.mrb[1].mxu1 }
 0x1d9   : > { %v743_v21 = vadd.f32 %v1346_v18, %v742_v20  ;;  %v1118_v22 = vpop.f32.mrb[2].mxu1 }
 0x1da   : > { %872 = vst.msk [vmem:[%s1351_s16 + $0x10] sm:$0xff] %vm869_vm0, %v751_v19  ;;  %v754_v23 = vadd.f32 %v1118_v22, %v1346_v18  ;;  %v745_v24 = vpop.f32.mrb[3].mxu1 }
 0x1db   : > { %870 = vst.msk [vmem:[%s1351_s16] sm:$0xff] %vm869_vm0, %v743_v21  ;;  %v746_v25 = vadd.f32 %v1346_v18, %v745_v24 }
 0x1dc   : > { %873 = vst.msk [vmem:[%s1351_s16 + $0x18] sm:$0xff] %vm869_vm0, %v754_v23 }
 0x1dd   : > { %871 = vst.msk [vmem:[%s1351_s16 + $0x8] sm:$0xff] %vm869_vm0, %v746_v25 }
 0x1df   : > { %v1121_v26 = vpop.f32.mrb[4].mxu1 }
 0x1e0   : > { %v767_v27 = vadd.f32 %v1121_v26, %v1346_v18  ;;  %v758_v28 = vpop.f32.mrb[5].mxu1 }
 0x1e1   : > { %v759_v29 = vadd.f32 %v1346_v18, %v758_v28  ;;  %v1122_v30 = vpop.f32.mrb[6].mxu1 }
 0x1e2   : > { %876 = vst.msk [vmem:[%s1351_s16 + $0x30] sm:$0xff] %vm869_vm0, %v767_v27  ;;  %v770_v31 = vadd.f32 %v1122_v30, %v1346_v18  ;;  %v761_v33 = vpop.f32.mrb[7].mxu1 }
 0x1e3   : > { %874 = vst.msk [vmem:[%s1351_s16 + $0x20] sm:$0xff] %vm869_vm0, %v759_v29  ;;  %v762_v34 = vadd.f32 %v1346_v18, %v761_v33 }
 0x1e4   : > { %877 = vst.msk [vmem:[%s1351_s16 + $0x38] sm:$0xff] %vm869_vm0, %v770_v31 }
 0x1e5   : > { %875 = vst.msk [vmem:[%s1351_s16 + $0x28] sm:$0xff] %vm869_vm0, %v762_v34 }
 0x1e7   : > { %v1125_v35 = vpop.f32.mrb[8].mxu1 }
 0x1e8   : > { %v783_v36 = vadd.f32 %v1125_v35, %v1346_v18  ;;  %v774_v37 = vpop.f32.mrb[9].mxu1 }
 0x1e9   : > { %v775_v38 = vadd.f32 %v1346_v18, %v774_v37  ;;  %v1126_v39 = vpop.f32.mrb[10].mxu1 }
 0x1ea   : > { %880 = vst.msk [vmem:[%s1351_s16 + $0x50] sm:$0xff] %vm869_vm0, %v783_v36  ;;  %v786_v40 = vadd.f32 %v1126_v39, %v1346_v18  ;;  %v777_v41 = vpop.f32.mrb[11].mxu1 }
 0x1eb   : > { %878 = vst.msk [vmem:[%s1351_s16 + $0x40] sm:$0xff] %vm869_vm0, %v775_v38  ;;  %v778_v42 = vadd.f32 %v1346_v18, %v777_v41 }
 0x1ec   : > { %881 = vst.msk [vmem:[%s1351_s16 + $0x58] sm:$0xff] %vm869_vm0, %v786_v40 }
 0x1ed   : > { %879 = vst.msk [vmem:[%s1351_s16 + $0x48] sm:$0xff] %vm869_vm0, %v778_v42 }
 0x1ef   : > { %v1129_v43 = vpop.f32.mrb[12].mxu1 }
 0x1f0   : > { %v799_v44 = vadd.f32 %v1129_v43, %v1346_v18  ;;  %v790_v45 = vpop.f32.mrb[13].mxu1 }
 0x1f1   : > { %v791_v46 = vadd.f32 %v1346_v18, %v790_v45  ;;  %v1130_v47 = vpop.f32.mrb[14].mxu1 }
 0x1f2   : > { %884 = vst.msk [vmem:[%s1351_s16 + $0x70] sm:$0xff] %vm869_vm0, %v799_v44  ;;  %v802_v48 = vadd.f32 %v1130_v47, %v1346_v18  ;;  %v793_v49 = vpop.f32.mrb[15].mxu1 }
 0x1f3   : > { %882 = vst.msk [vmem:[%s1351_s16 + $0x60] sm:$0xff] %vm869_vm0, %v791_v46  ;;  %v794_v50 = vadd.f32 %v1346_v18, %v793_v49 }
 0x1f4   : > { %885 = vst.msk [vmem:[%s1351_s16 + $0x78] sm:$0xff] %vm869_vm0, %v802_v48 }
 0x1f5   : > { %883 = vst.msk [vmem:[%s1351_s16 + $0x68] sm:$0xff] %vm869_vm0, %v794_v50 }
 0x1f7   : > { %v1133_v51 = vpop.f32.mrb[16].mxu1 }
 0x1f8   : > { %v815_v52 = vadd.f32 %v1133_v51, %v1346_v18  ;;  %v806_v53 = vpop.f32.mrb[17].mxu1 }
 0x1f9   : > { %v807_v54 = vadd.f32 %v1346_v18, %v806_v53  ;;  %v1134_v55 = vpop.f32.mrb[18].mxu1 }
 0x1fa   : > { %888 = vst.msk [vmem:[%s1351_s16 + $0x90] sm:$0xff] %vm869_vm0, %v815_v52  ;;  %v818_v56 = vadd.f32 %v1134_v55, %v1346_v18  ;;  %v809_v57 = vpop.f32.mrb[19].mxu1 }
 0x1fb   : > { %886 = vst.msk [vmem:[%s1351_s16 + $0x80] sm:$0xff] %vm869_vm0, %v807_v54  ;;  %v810_v58 = vadd.f32 %v1346_v18, %v809_v57 }
 0x1fc   : > { %889 = vst.msk [vmem:[%s1351_s16 + $0x98] sm:$0xff] %vm869_vm0, %v818_v56 }
 0x1fd   : > { %887 = vst.msk [vmem:[%s1351_s16 + $0x88] sm:$0xff] %vm869_vm0, %v810_v58 }
 0x1ff   : > { %v1137_v59 = vpop.f32.mrb[20].mxu1 }
 0x200   : > { %v831_v60 = vadd.f32 %v1137_v59, %v1346_v18  ;;  %v822_v61 = vpop.f32.mrb[21].mxu1 }
 0x201   : > { %v823_v62 = vadd.f32 %v1346_v18, %v822_v61  ;;  %v1138_v63 = vpop.f32.mrb[22].mxu1 }
 0x202   : > { %892 = vst.msk [vmem:[%s1351_s16 + $0xb0] sm:$0xff] %vm869_vm0, %v831_v60  ;;  %v834_v0 = vadd.f32 %v1138_v63, %v1346_v18  ;;  %v825_v1 = vpop.f32.mrb[23].mxu1 }
 0x203   : > { %890 = vst.msk [vmem:[%s1351_s16 + $0xa0] sm:$0xff] %vm869_vm0, %v823_v62  ;;  %v826_v2 = vadd.f32 %v1346_v18, %v825_v1 }
 0x204   : > { %893 = vst.msk [vmem:[%s1351_s16 + $0xb8] sm:$0xff] %vm869_vm0, %v834_v0 }
 0x205   : > { %891 = vst.msk [vmem:[%s1351_s16 + $0xa8] sm:$0xff] %vm869_vm0, %v826_v2 }
 0x207   : > { %v1141_v3 = vpop.f32.mrb[24].mxu1 }
 0x208   : > { %v847_v4 = vadd.f32 %v1141_v3, %v1346_v18  ;;  %v838_v5 = vpop.f32.mrb[25].mxu1 }
 0x209   : > { %v839_v6 = vadd.f32 %v1346_v18, %v838_v5  ;;  %v1142_v7 = vpop.f32.mrb[26].mxu1 }
 0x20a   : > { %896 = vst.msk [vmem:[%s1351_s16 + $0xd0] sm:$0xff] %vm869_vm0, %v847_v4  ;;  %v850_v8 = vadd.f32 %v1142_v7, %v1346_v18  ;;  %v841_v9 = vpop.f32.mrb[27].mxu1 }
 0x20b   : > { %894 = vst.msk [vmem:[%s1351_s16 + $0xc0] sm:$0xff] %vm869_vm0, %v839_v6  ;;  %v842_v10 = vadd.f32 %v1346_v18, %v841_v9 }
 0x20c   : > { %897 = vst.msk [vmem:[%s1351_s16 + $0xd8] sm:$0xff] %vm869_vm0, %v850_v8 }
 0x20d   : > { %895 = vst.msk [vmem:[%s1351_s16 + $0xc8] sm:$0xff] %vm869_vm0, %v842_v10 }
 0x20f   : > { %v1145_v11 = vpop.f32.mrb[28].mxu1 }
 0x210   : > { %v863_v12 = vadd.f32 %v1145_v11, %v1346_v18  ;;  %v854_v13 = vpop.f32.mrb[29].mxu1 }
 0x211   : > { %v855_v14 = vadd.f32 %v1346_v18, %v854_v13  ;;  %v1146_v15 = vpop.f32.mrb[30].mxu1 }
 0x212   : > { %900 = vst.msk [vmem:[%s1351_s16 + $0xf0] sm:$0xff] %vm869_vm0, %v863_v12  ;;  %v866_v16 = vadd.f32 %v1146_v15, %v1346_v18  ;;  %v857_v17 = vpop.f32.mrb[31].mxu1 }
 0x213   : > { %898 = vst.msk [vmem:[%s1351_s16 + $0xe0] sm:$0xff] %vm869_vm0, %v855_v14  ;;  %v858_v32 = vadd.f32 %v1346_v18, %v857_v17 }
 0x214   : > { %901 = vst.msk [vmem:[%s1351_s16 + $0xf8] sm:$0xff] %vm869_vm0, %v866_v16 }
 0x215   : > { %899 = vst.msk [vmem:[%s1351_s16 + $0xe8] sm:$0xff] %vm869_vm0, %v858_v32 }
 0x216 PF: > { %s15_s18 = sadd.s32 1, %s1193_s18  }
 0x217   : > { %p12_p4 = scmp.ge.s32.totalorder %s15_s18, 4  }
 0x219   :  { %14 = sbr.rel (!%p12_p4) target bundleno = 1 (0x1), region = 70 }

</bundles_post_ra>
